<compile_context>
chip_gen: v6e
topology: v6e:2x2x1
jax: 0.10.0
libtpu: 0.0.40
codegen_flags: <defaults>
</compile_context>

<pallas_src>
import jax
import jax.numpy as jnp
from jax.experimental import pallas as pl
from jax.experimental.pallas import tpu as pltpu

BN_EPS = 1e-5
_MAX_B_TILE = 16  # static unroll bound for the in-kernel batch loop


def _round_up(x, m):
    return (x + m - 1) // m * m


def _sublane(dtype):
    itemsize = jnp.dtype(dtype).itemsize
    return {4: 8, 2: 16, 1: 32}.get(itemsize, 8)


def _vmem_limit_bytes():
    """Generation-aware VMEM budget (v5e/v6e: 128 MiB physical, v7x: 64 MiB)."""
    cap = 64 * 1024 * 1024
    try:
        info = pltpu.get_tpu_info()
        cap = int(getattr(info, "vmem_capacity_bytes", cap)) or cap
    except Exception:
        pass
    # Leave headroom for executable / compiler scratch; cap at 96 MiB on big-VMEM chips.
    return max(32 * 1024 * 1024, min(int(cap * 3 // 4), 96 * 1024 * 1024))


def _pick_tiles(n, cin, cout, hw_pad, x_dtype, out_dtype, vmem_limit):
    """Pick (b_tile, tile_hw) so double-buffered in+out blocks stay within ~60% of the
    VMEM budget while each streaming block is as big as possible (amortize step cost)."""
    x_bytes = jnp.dtype(x_dtype).itemsize
    o_bytes = jnp.dtype(out_dtype).itemsize
    cin_p = _round_up(cin, _sublane(x_dtype))     # sublane padding of small channel dims
    cout_p = _round_up(cout, _sublane(out_dtype))
    bytes_per_lane = 2 * (cin_p * x_bytes + cout_p * o_bytes)  # x2: double-buffered
    usable = int(vmem_limit * 0.6)
    max_lanes = max(128, usable // bytes_per_lane)

    # Largest multiple of 128 that divides hw_pad and fits the lane budget.
    tile_hw = 128
    t = 128
    while t <= min(hw_pad, max_lanes):
        if hw_pad % t == 0:
            tile_hw = t
        t += 128

    # Pack batch images into the block while lanes stay within budget.
    b_cap = max(1, min(n, _MAX_B_TILE, max_lanes // tile_hw))
    b_tile = 1
    for d in range(1, b_cap + 1):
        if n % d == 0:
            b_tile = d
    return b_tile, tile_hw


def simple_fcn_forward(feature, conv_w, bn_gamma, bn_beta):
    """feature: (N, Cin, H, W) NCHW (as in PyTorch).
       conv_w:  (Cout, Cin, 1, 1); bn_gamma / bn_beta: (Cout,).
       Returns (N, Cout, H, W) with feature.dtype."""
    n, cin, h, w = feature.shape
    cout = conv_w.shape[0]
    hw = h * w
    m_true = n * hw  # BN sample count per channel (pad columns excluded)

    out_dtype = feature.dtype
    hw_pad = _round_up(hw, 128)
    vmem_limit = _vmem_limit_bytes()
    b_tile, tile_hw = _pick_tiles(n, cin, cout, hw_pad, feature.dtype, out_dtype, vmem_limit)
    num_b_groups = n // b_tile
    num_hw_tiles = hw_pad // tile_hw

    # Free, contiguous reshape; zero-pad spatial axis up to a multiple of 128.
    x3 = feature.reshape(n, cin, hw)
    if hw_pad != hw:
        x3 = jnp.pad(x3, ((0, 0), (0, 0), (0, hw_pad - hw)))

    gram_precision = (jax.lax.Precision.HIGHEST
                      if x3.dtype == jnp.float32 else None)

    # ------------------------- Phase 1: per-channel input moments -------------------------
    def stats_kernel(x_ref, sum_ref, gram_ref):
        # x_ref: (b_tile, cin, tile_hw); sum_ref: (1, cin, 1); gram_ref: (1, cin, cin)
        @pl.when(pl.program_id(1) == 0)
        def _():
            sum_ref[...] = jnp.zeros_like(sum_ref)
            gram_ref[...] = jnp.zeros_like(gram_ref)

        s = jnp.zeros((cin, 1), jnp.float32)
        g = jnp.zeros((cin, cin), jnp.float32)
        for b in range(b_tile):  # static unroll, b_tile <= 16
            x = x_ref[b]  # (cin, tile_hw)
            s = s + jnp.sum(x, axis=1, keepdims=True, dtype=jnp.float32)
            g = g + jax.lax.dot_general(
                x, x, dimension_numbers=(((1,), (1,)), ((), ())),
                preferred_element_type=jnp.float32,
                precision=gram_precision)
        sum_ref[0] += s
        gram_ref[0] += g

    x_stream_bytes = x3.size * jnp.dtype(x3.dtype).itemsize
    stats_cost = pl.CostEstimate(
        flops=2 * n * hw_pad * cin * cin + n * hw_pad * cin,
        transcendentals=0,
        bytes_accessed=x_stream_bytes + num_b_groups * cin * (cin + 1) * 4)

    part_sum, part_gram = pl.pallas_call(
        stats_kernel,
        out_shape=(jax.ShapeDtypeStruct((num_b_groups, cin, 1), jnp.float32),
                   jax.ShapeDtypeStruct((num_b_groups, cin, cin), jnp.float32)),
        grid=(num_b_groups, num_hw_tiles),
        in_specs=[pl.BlockSpec((b_tile, cin, tile_hw), lambda b, t: (b, 0, t))],
        out_specs=(pl.BlockSpec((1, cin, 1), lambda b, t: (b, 0, 0)),
                   pl.BlockSpec((1, cin, cin), lambda b, t: (b, 0, 0))),
        compiler_params=pltpu.CompilerParams(
            dimension_semantics=("parallel", "arbitrary"),
            vmem_limit_bytes=vmem_limit),
        cost_estimate=stats_cost,
    )(x3)

    sum_x = jnp.sum(part_sum, axis=0)   # (cin, 1)
    gram = jnp.sum(part_gram, axis=0)   # (cin, cin)

    # -------------- Fold training-mode BatchNorm into the conv weight (tiny JAX) ----------
    w2d = conv_w.reshape(cout, cin).astype(jnp.float32)
    mf = jnp.float32(m_true)
    mean_y = (w2d @ sum_x[:, 0]) / mf                     # E[y]    (cout,)
    ey2 = jnp.einsum('oi,ij,oj->o', w2d, gram, w2d) / mf  # E[y^2]  (cout,)
    var_y = jnp.maximum(ey2 - mean_y * mean_y, 0.0)       # biased var (training BN)
    inv_std = jax.lax.rsqrt(var_y + jnp.float32(BN_EPS))
    scale = bn_gamma.astype(jnp.float32) * inv_std
    bias = bn_beta.astype(jnp.float32) - mean_y * scale
    w_scaled = w2d * scale[:, None]                       # (cout, cin)
    bias2d = bias[:, None]                                # (cout, 1)

    # ------------------------------ Phase 2: out = W' x + b' ------------------------------
    def apply_kernel(x_ref, w_ref, b_ref, o_ref):
        # x_ref: (b_tile, cin, tile_hw); w_ref: (cout, cin); b_ref: (cout, 1)
        # o_ref: (b_tile, cout, tile_hw) -> tile_hw >= 128 lanes, unmasked stores
        wk = w_ref[...]
        bk = b_ref[...]
        for b in range(b_tile):  # static unroll
            y = jnp.dot(wk, x_ref[b], preferred_element_type=jnp.float32)
            o_ref[b] = (y + bk).astype(o_ref.dtype)

    out_stream_bytes = n * cout * hw_pad * jnp.dtype(out_dtype).itemsize
    apply_cost = pl.CostEstimate(
        flops=2 * n * hw_pad * cin * cout + n * hw_pad * cout,
        transcendentals=0,
        bytes_accessed=x_stream_bytes + out_stream_bytes + (cout * cin + cout) * 4)

    out3 = pl.pallas_call(
        apply_kernel,
        out_shape=jax.ShapeDtypeStruct((n, cout, hw_pad), out_dtype),
        grid=(num_b_groups, num_hw_tiles),
        in_specs=[
            pl.BlockSpec((b_tile, cin, tile_hw), lambda b, t: (b, 0, t)),
            pl.BlockSpec((cout, cin), lambda b, t: (0, 0)),
            pl.BlockSpec((cout, 1), lambda b, t: (0, 0)),
        ],
        out_specs=pl.BlockSpec((b_tile, cout, tile_hw), lambda b, t: (b, 0, t)),
        compiler_params=pltpu.CompilerParams(
            dimension_semantics=("parallel", "parallel"),
            vmem_limit_bytes=vmem_limit),
        cost_estimate=apply_cost,
    )(x3, w_scaled, bias2d)

    if hw_pad != hw:
        out3 = out3[:, :, :hw]
    return out3.reshape(n, cout, h, w)


def init_params(key, input_channel, out_channel=32):
    # Mirrors nn.Conv2d default (kaiming-uniform bound) and nn.BatchNorm2d defaults.
    kw, = jax.random.split(key, 1)
    fan_in = input_channel * 1 * 1
    bound = 1.0 / jnp.sqrt(jnp.float32(fan_in))
    conv_w = jax.random.uniform(
        kw, (out_channel, input_channel, 1, 1),
        minval=-bound, maxval=bound, dtype=jnp.float32)
    bn_gamma = jnp.ones((out_channel,), jnp.float32)
    bn_beta = jnp.zeros((out_channel,), jnp.float32)
    return conv_w, bn_gamma, bn_beta


if __name__ == "__main__":
    key = jax.random.PRNGKey(0)
    k_x, k_p = jax.random.split(key)

    N, C_IN, H, W = 2, 4, 16, 16
    x = jax.random.normal(k_x, (N, C_IN, H, W), dtype=jnp.float32)

    conv_w, bn_gamma, bn_beta = init_params(k_p, C_IN)

    out = simple_fcn_forward(x, conv_w, bn_gamma, bn_beta)
    out = jax.block_until_ready(out)

    assert out.shape == (N, 32, H, W), out.shape

    # Pure-JAX reference (1x1 conv as matmul + training-mode BatchNorm2d, biased var).
    x2d = jnp.transpose(x, (0, 2, 3, 1)).reshape(-1, C_IN)
    y = x2d @ conv_w.reshape(32, C_IN).T
    mean = y.mean(axis=0, keepdims=True)
    var = ((y - mean) ** 2).mean(axis=0, keepdims=True)
    ref2d = (y - mean) / jnp.sqrt(var + BN_EPS) * bn_gamma + bn_beta
    ref = jnp.transpose(ref2d.reshape(N, H, W, 32), (0, 3, 1, 2))
    assert jnp.allclose(out, ref, atol=1e-4, rtol=1e-4), float(jnp.max(jnp.abs(out - ref)))

    print("KERNEL_OK")
</pallas_src>

<mosaic_0001>
module attributes {stable_mosaic.version = 11 : i64} {
  func.func @stats_kernel(%arg0: i32, %arg1: i32, %arg2: memref<2x4x256xf32, #tpu.memory_space<vmem>>, %arg3: memref<1x4x1xf32, #tpu.memory_space<vmem>>, %arg4: memref<1x4x4xf32, #tpu.memory_space<vmem>>) attributes {dimension_semantics = [#tpu.dimension_semantics<parallel>, #tpu.dimension_semantics<arbitrary>], iteration_bounds = array<i64: 1, 1>, scalar_prefetch = 0 : i64, scratch_operands = 0 : i64, tpu.core_type = #tpu.core_type<tc>, window_params = [{transform_indices = @transform_0, window_bounds = array<i64: 2, 4, 256>}, {transform_indices = @transform_1, window_bounds = array<i64: 1, 4, 1>}, {transform_indices = @transform_2, window_bounds = array<i64: 1, 4, 4>}]} {
    %c0_i32 = arith.constant 0 : i32
    %0 = arith.cmpi eq, %arg1, %c0_i32 : i32
    %1 = arith.extui %0 : i1 to i32
    %c0_i32_0 = arith.constant 0 : i32
    %2 = arith.cmpi ne, %1, %c0_i32_0 : i32
    scf.if %2 {
      %cst_22 = arith.constant 0.000000e+00 : f32
      %31 = vector.broadcast %cst_22 : f32 to vector<1x4x1xf32>
      %c0_23 = arith.constant 0 : index
      %c0_24 = arith.constant 0 : index
      %c0_25 = arith.constant 0 : index
      %32 = vector.load %arg3[%c0_23, %c0_24, %c0_25] : memref<1x4x1xf32, #tpu.memory_space<vmem>>, vector<1x4x1xf32>
      tpu.vector_store %arg3[%c0_23, %c0_24, %c0_25], %31 {strides = array<i32>} : memref<1x4x1xf32, #tpu.memory_space<vmem>>, vector<1x4x1xf32>,
      %cst_26 = arith.constant 0.000000e+00 : f32
      %33 = vector.broadcast %cst_26 : f32 to vector<1x4x4xf32>
      %c0_27 = arith.constant 0 : index
      %c0_28 = arith.constant 0 : index
      %c0_29 = arith.constant 0 : index
      %34 = vector.load %arg4[%c0_27, %c0_28, %c0_29] : memref<1x4x4xf32, #tpu.memory_space<vmem>>, vector<1x4x4xf32>
      tpu.vector_store %arg4[%c0_27, %c0_28, %c0_29], %33 {strides = array<i32>} : memref<1x4x4xf32, #tpu.memory_space<vmem>>, vector<1x4x4xf32>,
    } else {
    }
    %cst = arith.constant 0.000000e+00 : f32
    %3 = vector.broadcast %cst : f32 to vector<4x1xf32>
    %cst_1 = arith.constant 0.000000e+00 : f32
    %4 = vector.broadcast %cst_1 : f32 to vector<4x4xf32>
    %c0 = arith.constant 0 : index
    %c0_2 = arith.constant 0 : index
    %c0_3 = arith.constant 0 : index
    %5 = vector.load %arg2[%c0, %c0_2, %c0_3] : memref<2x4x256xf32, #tpu.memory_space<vmem>>, vector<1x4x256xf32>
    %6 = vector.shape_cast %5 : vector<1x4x256xf32> to vector<4x256xf32>
    %cst_4 = arith.constant dense<0.000000e+00> : vector<4xf32>
    %7 = vector.multi_reduction <add>, %6, %cst_4 [1] : vector<4x256xf32> to vector<4xf32>
    %8 = vector.shape_cast %7 : vector<4xf32> to vector<4x1xf32>
    %9 = arith.addf %3, %8 : vector<4x1xf32>
    %cst_5 = arith.constant dense<0.000000e+00> : vector<4x4xf32>
    %10 = tpu.matmul %6, %6, %cst_5 {dimension_numbers = #tpu.dot_dimension_numbers<[1], [1], [0], [0], [0, 0, 1, 0], [], []>, precision = #tpu.contract_precision<fp32>} : vector<4x256xf32>, vector<4x256xf32>, vector<4x4xf32> -> vector<4x4xf32>
    %11 = arith.addf %4, %10 : vector<4x4xf32>
    %c1 = arith.constant 1 : index
    %c0_6 = arith.constant 0 : index
    %c0_7 = arith.constant 0 : index
    %12 = vector.load %arg2[%c1, %c0_6, %c0_7] : memref<2x4x256xf32, #tpu.memory_space<vmem>>, vector<1x4x256xf32>
    %13 = vector.shape_cast %12 : vector<1x4x256xf32> to vector<4x256xf32>
    %cst_8 = arith.constant dense<0.000000e+00> : vector<4xf32>
    %14 = vector.multi_reduction <add>, %13, %cst_8 [1] : vector<4x256xf32> to vector<4xf32>
    %15 = vector.shape_cast %14 : vector<4xf32> to vector<4x1xf32>
    %16 = arith.addf %9, %15 : vector<4x1xf32>
    %cst_9 = arith.constant dense<0.000000e+00> : vector<4x4xf32>
    %17 = tpu.matmul %13, %13, %cst_9 {dimension_numbers = #tpu.dot_dimension_numbers<[1], [1], [0], [0], [0, 0, 1, 0], [], []>, precision = #tpu.contract_precision<fp32>} : vector<4x256xf32>, vector<4x256xf32>, vector<4x4xf32> -> vector<4x4xf32>
    %18 = arith.addf %11, %17 : vector<4x4xf32>
    %c0_10 = arith.constant 0 : index
    %c0_11 = arith.constant 0 : index
    %c0_12 = arith.constant 0 : index
    %19 = vector.load %arg3[%c0_10, %c0_11, %c0_12] : memref<1x4x1xf32, #tpu.memory_space<vmem>>, vector<1x4x1xf32>
    %20 = vector.shape_cast %19 : vector<1x4x1xf32> to vector<4x1xf32>
    %21 = arith.addf %20, %16 : vector<4x1xf32>
    %c0_13 = arith.constant 0 : index
    %c0_14 = arith.constant 0 : index
    %c0_15 = arith.constant 0 : index
    %22 = vector.load %arg3[%c0_13, %c0_14, %c0_15] : memref<1x4x1xf32, #tpu.memory_space<vmem>>, vector<1x4x1xf32>
    %23 = vector.shape_cast %22 : vector<1x4x1xf32> to vector<4x1xf32>
    %24 = vector.shape_cast %21 : vector<4x1xf32> to vector<1x4x1xf32>
    tpu.vector_store %arg3[%c0_13, %c0_14, %c0_15], %24 {strides = array<i32>} : memref<1x4x1xf32, #tpu.memory_space<vmem>>, vector<1x4x1xf32>,
    %c0_16 = arith.constant 0 : index
    %c0_17 = arith.constant 0 : index
    %c0_18 = arith.constant 0 : index
    %25 = vector.load %arg4[%c0_16, %c0_17, %c0_18] : memref<1x4x4xf32, #tpu.memory_space<vmem>>, vector<1x4x4xf32>
    %26 = vector.shape_cast %25 : vector<1x4x4xf32> to vector<4x4xf32>
    %27 = arith.addf %26, %18 : vector<4x4xf32>
    %c0_19 = arith.constant 0 : index
    %c0_20 = arith.constant 0 : index
    %c0_21 = arith.constant 0 : index
    %28 = vector.load %arg4[%c0_19, %c0_20, %c0_21] : memref<1x4x4xf32, #tpu.memory_space<vmem>>, vector<1x4x4xf32>
    %29 = vector.shape_cast %28 : vector<1x4x4xf32> to vector<4x4xf32>
    %30 = vector.shape_cast %27 : vector<4x4xf32> to vector<1x4x4xf32>
    tpu.vector_store %arg4[%c0_19, %c0_20, %c0_21], %30 {strides = array<i32>} : memref<1x4x4xf32, #tpu.memory_space<vmem>>, vector<1x4x4xf32>,
    return
  }
  func.func @transform_0(%arg0: i32, %arg1: i32) -> (i32, i32, i32) {
    %c0_i32 = arith.constant 0 : i32
    %c0_i32_0 = arith.constant 0 : i32
    return %arg0, %c0_i32, %arg1 : i32, i32, i32
  }
  func.func @transform_1(%arg0: i32, %arg1: i32) -> (i32, i32, i32) {
    %c0_i32 = arith.constant 0 : i32
    %c0_i32_0 = arith.constant 0 : i32
    %c0_i32_1 = arith.constant 0 : i32
    return %arg0, %c0_i32, %c0_i32_0 : i32, i32, i32
  }
  func.func @transform_2(%arg0: i32, %arg1: i32) -> (i32, i32, i32) {
    %c0_i32 = arith.constant 0 : i32
    %c0_i32_0 = arith.constant 0 : i32
    %c0_i32_1 = arith.constant 0 : i32
    return %arg0, %c0_i32, %c0_i32_0 : i32, i32, i32
  }
}

</mosaic_0001>

<bundles_post_ra>
// kernel: tpu_custom_call.1
= control target key start
LH: loop header
LB: loop body
LE: loop exit
PB: predicated region body
PF: predicated region fallthrough
CT: control target
= control target key end

     0   :  { %8 = vsyncpa [#allocation3], 0  ;;  %s1125_s0 = inlined_call_operand.hbm [shape: f32[2,4,256], index: 0, kind: input, shape index: {}]   ;;  %s1126_s1 = inlined_call_operand.vmem [shape: f32[1,4,1], index: 1, kind: output, shape index: {0}]   ;;  %s1127_s2 = inlined_call_operand.hbm [shape: f32[1,4,4], index: 2, kind: output, shape index: {1}]  }
   0x1   :  { %9 = vsyncpa [#allocation4], 0  ;;  %s1077_s9 = smov [#allocation2]  }
   0x2   :  { %s15_s10 = sshll.u32 %s1077_s9, 4  ;;  %s16_s10 = int_to_ptr.vmem [resolvable:$true] %s15_s10 }
   0x3   :  { %s1041_s11 = scalar_lea.vmem %s16_s10, 256  ;;  %p1046_p1 = scmp.lt.s32.totalorder %s16_s10, %s16_s10 }
   0x4   :  { %p1042_p0 = scmp.ne.s32.totalorder %s16_s10, %s1041_s11  ;;  %p1047_p2 = scmp.lt.s32.totalorder %s1041_s11, %s1041_s11 }
   0x6   :  { %p1048_p3 = por %p1047_p2, %p1046_p1 }
   0x8   :  { %p1049_p4 = pnand %p1048_p3, %p1042_p0 }
   0xa   :  { %1052 = shalt.err (!%p1049_p4)
}
   0xb   :  { %s1078_s12 = smov 128   ;;  %s1079_s13 = smov 8  }
   0xc   :  { %21 = dma.hbm_to_vmem [thread:$0]  %s1125_s0, 256, %s16_s10, [#allocation3], %s1078_s12, %s1078_s12, %s1079_s13  }
   0xd   :  { %1073 = dma.done.wait [#allocation3], 256  }
   0xe   :  { %1074 = vsyncadd [#allocation3], 4294967040  ;;  %vm31_vm0 = vcmask 27648   ;;  %v1080_v0 = vmov 0.0   ;;  %v45_v1 = vld [vmem:[#allocation2 + $0x8] sm:$0xff]  ;;  %v33_v2 = vld [vmem:[#allocation2] sm:$0xff] }
   0xf   :  { %32 = vst.msk [vmem:[#allocation5] sm:$0xf] %vm31_vm0, %v1080_v0  ;;  %vm37_vm1 = vcmask 1043456   ;;  %v47_v3 = vcombine.high %v45_v1, %v45_v1  ;;  %v87_v4 = vand.u32 4294901760, %v45_v1  ;;  %v35_v5 = vcombine.high %v33_v2, %v33_v2 }
  0x10   :  { %v38_v8 = vsel %vm37_vm1, %v33_v2, 0.0  ;;  %v49_v13 = vsel %vm37_vm1, %v45_v1, 0.0  ;;  %v559_v15 = vand.u32 4294901760, %v33_v2  ;;  %vm29_vm2 = vcmask 3072  }
  0x11   :  { %v85_v6 = vand.u32 4294901760, %v47_v3  ;;  %v128_v7 = vsub.f32 %v45_v1, %v87_v4  ;;  %v1102_v9 = vand.u32 4294901760, %v35_v5  ;;  %v39_v10 = vsel %vm37_vm1, %v35_v5, 0.0  ;;  %30 = vst.msk [vmem:[%s1126_s1] sm:$0xf] %vm29_vm2, %v1080_v0 }
  0x12   :  { %v50_v14 = vsel %vm37_vm1, %v47_v3, 0.0  ;;  %v40_v16 = vadd.f32 %v39_v10, %v38_v8  ;;  %v600_v23 = vsub.f32 %v33_v2, %v559_v15 }
  0x13   :  { %86 = vmatprep.subr.mxu0 %v85_v6  ;;  %v122_v11 = vsub.f32 %v47_v3, %v85_v6  ;;  %v129_v12 = vand.u32 4294901760, %v128_v7  ;;  %212 = vmatprep.mubr.f32.mxu1 %v85_v6  ;;  %v594_v19 = vsub.f32 %v35_v5, %v1102_v9  ;;  %v51_v20 = vadd.f32 %v50_v14, %v49_v13 }
  0x14   :  { %88 = vmatpush1.xpose.msra.mxu0 %v87_v4  ;;  %41 = vadd.xlane.f32.xlu0 %v40_v16  ;;  %v601_v26 = vand.u32 4294901760, %v600_v23 }
  0x15   :  { %v123_v17 = vand.u32 4294901760, %v122_v11  ;;  %v130_v18 = vsub.f32 %v128_v7, %v129_v12  ;;  %251 = vmatprep.subr.mxu0 %v122_v11  ;;  %v595_v25 = vand.u32 4294901760, %v594_v19 }
  0x16   :  { %v602_v28 = vsub.f32 %v600_v23, %v601_v26  ;;  %v1003_v5 = vld [vmem:[#allocation5] sm:$0xf] }
  0x17   :  { %v124_v21 = vsub.f32 %v122_v11, %v123_v17  ;;  %v131_v22 = vand.u32 4294901760, %v130_v18  ;;  %v596_v27 = vsub.f32 %v594_v19, %v595_v25 }
  0x18   :  { %52 = vadd.xlane.f32.xlu0 %v51_v20  ;;  %v603_v30 = vand.u32 4294901760, %v602_v28  ;;  %v999_v33 = vld [vmem:[%s1126_s1] sm:$0xf] }
  0x19   :  { %v125_v24 = vand.u32 4294901760, %v124_v21  ;;  %v597_v29 = vand.u32 4294901760, %v596_v27 }
  0x1b   :  { %126 = vmatprep.mubr.f32.mxu0 %v125_v24  ;;  %172 = vmatprep.subr.mxu1 %v125_v24 }
  0x1c   :  { %132 = vmatmul.mubr.f32.vlgmr.msra.gmra.mxu0 %v131_v22  ;;  %178 = vmatpush1.xpose.msra.mxu1 %v131_v22 }
  0x1d   :  { %254 = vmatpush1.xpose.msra.mxu0 %v128_v7  ;;  %289 = vmatprep.mubr.f32.mxu0 %v122_v11 }
  0x1e   :  { %328 = vmatprep.subr.mxu1 %v85_v6  ;;  %408 = vmatprep.subr.mxu0 %v123_v17 }
  0x1f   :  { %214 = vmatmul.mubr.f32.vlgmr.msra.gmra.mxu1 %v87_v4 }
  0x20   :  { %292 = vmatmul.mubr.f32.vlgmr.msra.gmra.mxu0 %v128_v7  ;;  %330 = vmatpush1.xpose.msra.mxu1 %v87_v4 }
  0x21   :  { %412 = vmatpush1.xpose.msra.mxu0 %v129_v12  ;;  %366 = vmatprep.mubr.f32.mxu1 %v123_v17 }
  0x22   :  { %446 = vmatprep.mubr.f32.mxu0 %v85_v6  ;;  %484 = vmatprep.subr.mxu1 %v85_v6 }
  0x23   :  { %370 = vmatmul.mubr.f32.vlgmr.msra.gmra.mxu1 %v129_v12  ;;  %558 = vmatprep.subr.mxu0 %v1102_v9 }
  0x24   :  { %448 = vmatmul.mubr.f32.vlgmr.msra.gmra.mxu0 %v87_v4  ;;  %486 = vmatpush1.xpose.msra.mxu1 %v87_v4 }
  0x25   :  { %560 = vmatpush1.xpose.msra.mxu0 %v559_v15  ;;  %520 = vmatprep.mubr.f32.mxu1 %v85_v6 }
  0x26   :  { %598 = vmatprep.mubr.f32.mxu0 %v597_v29  ;;  %644 = vmatprep.subr.mxu1 %v597_v29 }
  0x27   :  { %522 = vmatmul.mubr.f32.vlgmr.msra.gmra.mxu1 %v87_v4  ;;  %723 = vmatprep.subr.mxu0 %v594_v19 }
  0x28   :  { %604 = vmatmul.mubr.f32.vlgmr.msra.gmra.mxu0 %v603_v30  ;;  %650 = vmatpush1.xpose.msra.mxu1 %v603_v30 }
  0x29   :  { %726 = vmatpush1.xpose.msra.mxu0 %v600_v23  ;;  %684 = vmatprep.mubr.f32.mxu1 %v1102_v9 }
  0x2a   :  { %761 = vmatprep.mubr.f32.mxu0 %v594_v19  ;;  %800 = vmatprep.subr.mxu1 %v1102_v9 }
  0x2b   :  { %686 = vmatmul.mubr.f32.vlgmr.msra.gmra.mxu1 %v559_v15  ;;  %880 = vmatprep.subr.mxu0 %v595_v25 }
  0x2c   :  { %764 = vmatmul.mubr.f32.vlgmr.msra.gmra.mxu0 %v600_v23  ;;  %802 = vmatpush1.xpose.msra.mxu1 %v559_v15 }
  0x2d   :  { %884 = vmatpush1.xpose.msra.mxu0 %v601_v26  ;;  %838 = vmatprep.mubr.f32.mxu1 %v595_v25 }
  0x2e   :  { %918 = vmatprep.mubr.f32.mxu0 %v1102_v9  ;;  %956 = vmatprep.subr.mxu1 %v1102_v9 }
  0x2f   :  { %842 = vmatmul.mubr.f32.vlgmr.msra.gmra.mxu1 %v601_v26 }
  0x30   :  { %920 = vmatmul.mubr.f32.vlgmr.msra.gmra.mxu0 %v559_v15  ;;  %958 = vmatpush1.xpose.msra.mxu1 %v559_v15 }
  0x31   :  { %992 = vmatprep.mubr.f32.mxu1 %v1102_v9 }
  0x33   :  { %994 = vmatmul.mubr.f32.vlgmr.msra.gmra.mxu1 %v559_v15 }
  0x9d   :  { %v42_v31 = vpop.xlane.xlu0 %41 }
  0xa1   :  { %v53_v32 = vpop.xlane.xlu0 %52 }
  0xa2   :  { %v54_v34 = vadd.f32 %v53_v32, %v42_v31 }
  0xa4   :  { %v1000_v35 = vadd.f32 %v999_v33, %v54_v34 }
  0xa6   :  { %1002 = vst.msk [vmem:[%s1126_s1] sm:$0xf] %vm29_vm2, %v1000_v35  ;;  %s1081_s1 = smov [#allocation5]  }
  0xa7   :  { %s1015_s21 = sshll.u32 %s1081_s1, 4  ;;  %s1016_s21 = int_to_ptr.vmem [resolvable:$true] %s1015_s21 }
  0xa8   :  { %s1053_s22 = scalar_lea.vmem %s1016_s21, 64  ;;  %p1058_p6 = scmp.lt.s32.totalorder %s1016_s21, %s1016_s21 }
  0xa9   :  { %p1054_p5 = scmp.ne.s32.totalorder %s1016_s21, %s1053_s22  ;;  %p1059_p7 = scmp.lt.s32.totalorder %s1053_s22, %s1053_s22 }
  0xab   :  { %p1060_p8 = por %p1059_p7, %p1058_p6 }
  0xad   :  { %p1061_p9 = pnand %p1060_p8, %p1054_p5 }
  0xdc   :  { %v133_v36 = vpop.f32.mrf.mxu0 }
  0xde   :  { %v135_v37 = vpop.f32.mrf.mxu0 }
  0xdf   :  { %v215_v38 = vpop.f32.mrf.mxu1 }
  0xe0   :  { %v216_v39 = vadd.f32 %v215_v38, %v133_v36  ;;  %v293_v40 = vpop.f32.mrf.mxu0 }
  0xe1   :  { %v217_v41 = vpop.f32.mrf.mxu1 }
  0xe2   :  { %v294_v42 = vadd.f32 %v293_v40, %v216_v39  ;;  %v295_v43 = vpop.f32.mrf.mxu0 }
  0xe3   :  { %v371_v44 = vpop.f32.mrf.mxu1 }
  0xe4   :  { %v372_v45 = vadd.f32 %v371_v44, %v294_v42  ;;  %v449_v46 = vpop.f32.mrf.mxu0 }
  0xe5   :  { %v373_v47 = vpop.f32.mrf.mxu1 }
  0xe6   :  { %v450_v48 = vadd.f32 %v449_v46, %v372_v45  ;;  %v451_v49 = vpop.f32.mrf.mxu0 }
  0xe7   :  { %v523_v50 = vpop.f32.mrf.mxu1 }
  0xe8   :  { %v524_v51 = vadd.f32 %v523_v50, %v450_v48  ;;  %v605_v52 = vpop.f32.mrf.mxu0 }
  0xe9   :  { %v525_v53 = vpop.f32.mrf.mxu1 }
  0xea   :  { %v606_v54 = vadd.f32 %v605_v52, %v524_v51  ;;  %v607_v55 = vpop.f32.mrf.mxu0 }
  0xeb   :  { %v687_v56 = vpop.f32.mrf.mxu1 }
  0xec   :  { %v688_v57 = vadd.f32 %v687_v56, %v606_v54  ;;  %v765_v58 = vpop.f32.mrf.mxu0 }
  0xed   :  { %v689_v59 = vpop.f32.mrf.mxu1 }
  0xee   :  { %v766_v60 = vadd.f32 %v765_v58, %v688_v57  ;;  %v767_v61 = vpop.f32.mrf.mxu0 }
  0xef   :  { %v843_v62 = vpop.f32.mrf.mxu1 }
  0xf0   :  { %v844_v63 = vadd.f32 %v843_v62, %v766_v60  ;;  %v921_v0 = vpop.f32.mrf.mxu0 }
  0xf1   :  { %v845_v1 = vpop.f32.mrf.mxu1 }
  0xf2   :  { %v922_v2 = vadd.f32 %v921_v0, %v844_v63  ;;  %v923_v3 = vpop.f32.mrf.mxu0 }
  0xf3   :  { %v995_v4 = vpop.f32.mrf.mxu1 }
  0xf4   :  { %v996_v6 = vadd.f32 %v995_v4, %v922_v2 }
  0xf5   :  { %v997_v7 = vpop.f32.mrf.mxu1 }
  0xf6   :  { %v1004_v8 = vadd.f32 %v1003_v5, %v996_v6 }
  0xf8   :  { %1006 = vst.msk [vmem:[#allocation5] sm:$0xf] %vm31_vm0, %v1004_v8 }
  0xf9   :  { %1064 = shalt.err (!%p1061_p9)
}
  0xfa   :  { %1018 = dma.vmem_to_hbm [thread:$0]  %s1016_s21, 64, %s1127_s2, [#allocation4]  }
  0xfb   :  { %1075 = dma.done.wait [#allocation4], 64  }
  0xfc   :  { %1076 = vsyncadd [#allocation4], 4294967232 }
  0xfd   :  { %1024 = vsyncpa [#allocation3], 1 }
  0xfe   :  { %1025 = vsyncpa [#allocation4], 1 }

</bundles_post_ra>
